<compile_context>
chip_gen: v5e
topology: v5e:2x2
jax: 0.10.0
libtpu: 0.0.40
codegen_flags: <defaults>
</compile_context>

<pallas_src>
import functools

import jax
import jax.numpy as jnp
from jax.experimental import pallas as pl
from jax.experimental.pallas import tpu as pltpu


def _round_up(x, m):
    return (x + m - 1) // m * m


def _alphaghost_kernel(num_hidden, out_size,
                       x_ref,
                       cw_ref, cb_ref,          # conv1 (as linear)
                       hw_ref, hb_ref,          # stacked hidden layers
                       fw_ref, fb_ref,          # fc_out
                       headw_ref, headb_ref,    # fused policy+value head
                       out_ref):
    f32 = jnp.float32
    wdt = cw_ref.dtype   # matmul compute dtype (bf16 by default); f32 accumulation

    # conv1 (kernel_size=1 on a length-1 sequence) == linear + relu
    h = jnp.dot(x_ref[...].astype(wdt), cw_ref[...], preferred_element_type=f32)
    h = jnp.maximum(h + cb_ref[...], 0.0)

    # hidden layers (static unrolled; num_hidden is a compile-time constant)
    for layer in range(num_hidden):
        h = jnp.dot(h.astype(wdt), hw_ref[layer], preferred_element_type=f32)
        h = jnp.maximum(h + hb_ref[pl.ds(layer, 1), :], 0.0)

    # fc_out + relu
    h = jnp.dot(h.astype(wdt), fw_ref[...], preferred_element_type=f32)
    h = jnp.maximum(h + fb_ref[...], 0.0)

    # fused policy+value head: one lane-dense matmul (columns [0,O) = policy,
    # column O = value, columns > O = padding).
    logits = jnp.dot(h.astype(wdt), headw_ref[...], preferred_element_type=f32)
    logits = logits + headb_ref[...]

    col = jax.lax.broadcasted_iota(jnp.int32, logits.shape, 1)
    pol_mask = col < out_size                       # real policy columns only
    masked = jnp.where(pol_mask, logits, -1e30)     # exclude value + pad cols
    m = jnp.max(masked, axis=-1, keepdims=True)
    e = jnp.exp(masked - m)                         # padded columns -> 0
    inv = pl.reciprocal(jnp.sum(e, axis=-1, keepdims=True), approx=True)
    probs = e * inv

    val = jnp.tanh(logits[:, out_size:out_size + 1])        # (TB, 1)
    out_ref[...] = jnp.where(col == out_size, val, probs).astype(out_ref.dtype)


def prepare_kernel_params(params, *, nn_depth, compute_dtype=jnp.bfloat16):
    """One-time conversion of PyTorch-layout params to kernel layout.

    Weights are transposed to (in, out), padded to lane/MXU friendly sizes and
    the policy/value heads are fused into a single lane-dense head.  Do this
    once at init (not per forward call).
    """
    num_hidden = nn_depth - 1
    W, C, _ = params["conv1.weight"].shape
    O = params["policy_head.weight"].shape[0]

    C_pad = _round_up(C, 128)
    W_pad = _round_up(W, 128)
    O_pad = _round_up(O + 1, 128)   # +1 for the fused value column

    def pad2(a, rows, cols):
        return jnp.pad(a, ((0, rows - a.shape[0]), (0, cols - a.shape[1])))

    conv_w = pad2(params["conv1.weight"][:, :, 0].T, C_pad, W_pad).astype(compute_dtype)
    conv_b = pad2(params["conv1.bias"][None, :], 1, W_pad).astype(jnp.float32)

    L = max(num_hidden, 1)
    if num_hidden > 0:
        hid_w = jnp.stack([pad2(params[f"hidden.{i}.weight"].T, W_pad, W_pad)
                           for i in range(num_hidden)]).astype(compute_dtype)
        hid_b = jnp.stack([jnp.pad(params[f"hidden.{i}.bias"], (0, W_pad - W))
                           for i in range(num_hidden)]).astype(jnp.float32)
    else:
        hid_w = jnp.zeros((L, W_pad, W_pad), compute_dtype)
        hid_b = jnp.zeros((L, W_pad), jnp.float32)

    fc_w = pad2(params["fc_out.weight"].T, W_pad, W_pad).astype(compute_dtype)
    fc_b = pad2(params["fc_out.bias"][None, :], 1, W_pad).astype(jnp.float32)

    head_w = jnp.concatenate([params["policy_head.weight"].T,
                              params["value_head.weight"].T], axis=1)      # (W, O+1)
    head_b = jnp.concatenate([params["policy_head.bias"],
                              params["value_head.bias"]])[None, :]          # (1, O+1)
    head_w = pad2(head_w, W_pad, O_pad).astype(compute_dtype)
    head_b = pad2(head_b, 1, O_pad).astype(jnp.float32)

    return dict(conv_w=conv_w, conv_b=conv_b, hid_w=hid_w, hid_b=hid_b,
                fc_w=fc_w, fc_b=fc_b, head_w=head_w, head_b=head_b)


@functools.partial(jax.jit, static_argnames=("nn_depth", "out_size"))
def _alphaghost_forward_impl(x, kparams, *, nn_depth, out_size):
    num_hidden = nn_depth - 1
    B, C = x.shape
    C_pad, W_pad = kparams["conv_w"].shape
    O_pad = kparams["head_w"].shape[1]
    L = kparams["hid_w"].shape[0]

    # Batch tiling: pad B so every grid step is a full, sublane-aligned tile.
    max_tb = 256
    B_pad = _round_up(B, 8) if B <= max_tb else _round_up(B, max_tb)
    tb = min(max_tb, B_pad)
    x_pad = jnp.zeros((B_pad, C_pad), jnp.float32).at[:B, :C].set(x.astype(jnp.float32))

    grid = (B_pad // tb,)

    flops = 2 * B_pad * (C_pad * W_pad + num_hidden * W_pad * W_pad
                         + W_pad * W_pad + W_pad * O_pad)
    bytes_accessed = int(x_pad.size) * 4 + B_pad * O_pad * 4 + sum(
        int(v.size) * v.dtype.itemsize for v in kparams.values())
    cost = pl.CostEstimate(flops=flops,
                           transcendentals=B_pad * (O_pad + 2),
                           bytes_accessed=bytes_accessed)

    def pinned(shape):
        # Weight/bias blocks: full array, same block every grid step -> stays
        # resident in VMEM (no re-DMA across the batch grid).
        return pl.BlockSpec(shape, lambda b: (0,) * len(shape))

    kernel = functools.partial(_alphaghost_kernel, num_hidden, out_size)

    out = pl.pallas_call(
        kernel,
        grid=grid,
        in_specs=[
            pl.BlockSpec((tb, C_pad), lambda b: (b, 0)),     # x tile (pipelined)
            pinned((C_pad, W_pad)),                          # conv_w
            pinned((1, W_pad)),                              # conv_b
            pinned((L, W_pad, W_pad)),                       # hidden weights
            pinned((L, W_pad)),                              # hidden biases
            pinned((W_pad, W_pad)),                          # fc_w
            pinned((1, W_pad)),                              # fc_b
            pinned((W_pad, O_pad)),                          # fused head weight
            pinned((1, O_pad)),                              # fused head bias
        ],
        out_specs=pl.BlockSpec((tb, O_pad), lambda b: (b, 0)),
        out_shape=jax.ShapeDtypeStruct((B_pad, O_pad), jnp.float32),
        compiler_params=pltpu.CompilerParams(
            dimension_semantics=("parallel",),
            vmem_limit_bytes=48 * 1024 * 1024,
        ),
        cost_estimate=cost,
    )(x_pad, kparams["conv_w"], kparams["conv_b"], kparams["hid_w"],
      kparams["hid_b"], kparams["fc_w"], kparams["fc_b"],
      kparams["head_w"], kparams["head_b"])

    policy = out[:B, :out_size]
    value = out[:B, out_size:out_size + 1]
    return policy, value


def alphaghost_forward(x, kparams, *, nn_depth, out_size):
    """Forward pass. `kparams` comes from prepare_kernel_params (call once)."""
    return _alphaghost_forward_impl(x, kparams, nn_depth=nn_depth, out_size=out_size)


def init_params(key, *, in_channels, nn_width, nn_depth, output_size):
    """Deterministic synthetic parameters in PyTorch layout (out, in)."""
    num_hidden = nn_depth - 1
    keys = jax.random.split(key, 2 * (3 + num_hidden) + 2)
    ki = iter(keys)

    def u(k, shape, fan_in):
        bound = 1.0 / jnp.sqrt(fan_in)
        return jax.random.uniform(k, shape, jnp.float32, -bound, bound)

    params = {
        "conv1.weight": u(next(ki), (nn_width, in_channels, 1), in_channels),
        "conv1.bias": u(next(ki), (nn_width,), in_channels),
    }
    for i in range(num_hidden):
        params[f"hidden.{i}.weight"] = u(next(ki), (nn_width, nn_width), nn_width)
        params[f"hidden.{i}.bias"] = u(next(ki), (nn_width,), nn_width)
    params["fc_out.weight"] = u(next(ki), (nn_width, nn_width), nn_width)
    params["fc_out.bias"] = u(next(ki), (nn_width,), nn_width)
    params["policy_head.weight"] = u(next(ki), (output_size, nn_width), nn_width)
    params["policy_head.bias"] = u(next(ki), (output_size,), nn_width)
    params["value_head.weight"] = u(next(ki), (1, nn_width), nn_width)
    params["value_head.bias"] = u(next(ki), (1,), nn_width)
    return params


def reference_forward(x, params, *, nn_depth):
    """Pure-JAX reference replicating the PyTorch forward exactly (f32)."""
    h = jax.nn.relu(x @ params["conv1.weight"][:, :, 0].T + params["conv1.bias"])
    for i in range(nn_depth - 1):
        h = jax.nn.relu(h @ params[f"hidden.{i}.weight"].T + params[f"hidden.{i}.bias"])
    h = jax.nn.relu(h @ params["fc_out.weight"].T + params["fc_out.bias"])
    policy = jax.nn.softmax(h @ params["policy_head.weight"].T + params["policy_head.bias"], axis=1)
    value = jnp.tanh(h @ params["value_head.weight"].T + params["value_head.bias"])
    return policy, value


if __name__ == "__main__":
    # Small, module-consistent shapes.
    BATCH = 2
    IN_CHANNELS = 4      # input_shape[0]
    NN_WIDTH = 32
    NN_DEPTH = 3         # -> 2 hidden layers
    OUTPUT_SIZE = 8

    key = jax.random.PRNGKey(0)
    k_x, k_p = jax.random.split(key)
    x = jax.random.normal(k_x, (BATCH, IN_CHANNELS), jnp.float32)
    params = init_params(k_p, in_channels=IN_CHANNELS, nn_width=NN_WIDTH,
                         nn_depth=NN_DEPTH, output_size=OUTPUT_SIZE)

    ref_policy, ref_value = reference_forward(x, params, nn_depth=NN_DEPTH)

    # f32-weight run: tight check of kernel math / layout / fusion.
    kp_f32 = prepare_kernel_params(params, nn_depth=NN_DEPTH, compute_dtype=jnp.float32)
    policy, value = alphaghost_forward(x, kp_f32, nn_depth=NN_DEPTH, out_size=OUTPUT_SIZE)
    policy = jax.block_until_ready(policy)
    value = jax.block_until_ready(value)
    assert policy.shape == (BATCH, OUTPUT_SIZE) and value.shape == (BATCH, 1)
    assert jnp.allclose(policy, ref_policy, atol=2e-3, rtol=2e-3)
    assert jnp.allclose(value, ref_value, atol=2e-3, rtol=2e-3)

    # bf16-weight run (default perf config): looser tolerance.
    kp_bf16 = prepare_kernel_params(params, nn_depth=NN_DEPTH)
    policy16, value16 = alphaghost_forward(x, kp_bf16, nn_depth=NN_DEPTH, out_size=OUTPUT_SIZE)
    policy16 = jax.block_until_ready(policy16)
    value16 = jax.block_until_ready(value16)
    assert jnp.allclose(policy16, ref_policy, atol=5e-2, rtol=5e-2)
    assert jnp.allclose(value16, ref_value, atol=5e-2, rtol=5e-2)

    print("KERNEL_OK")
</pallas_src>

<mosaic_0001>
module attributes {stable_mosaic.version = 11 : i64} {
  func.func @_alphaghost_kernel(%arg0: i32, %arg1: memref<8x128xf32, #tpu.memory_space<vmem>>, %arg2: memref<128x128xf32, #tpu.memory_space<vmem>>, %arg3: memref<1x128xf32, #tpu.memory_space<vmem>>, %arg4: memref<2x128x128xf32, #tpu.memory_space<vmem>>, %arg5: memref<2x128xf32, #tpu.memory_space<vmem>>, %arg6: memref<128x128xf32, #tpu.memory_space<vmem>>, %arg7: memref<1x128xf32, #tpu.memory_space<vmem>>, %arg8: memref<128x128xf32, #tpu.memory_space<vmem>>, %arg9: memref<1x128xf32, #tpu.memory_space<vmem>>, %arg10: memref<8x128xf32, #tpu.memory_space<vmem>>) attributes {dimension_semantics = [#tpu.dimension_semantics<parallel>], iteration_bounds = array<i64: 1>, scalar_prefetch = 0 : i64, scratch_operands = 0 : i64, tpu.core_type = #tpu.core_type<tc>, window_params = [{transform_indices = @transform_0, window_bounds = array<i64: 8, 128>}, {pipeline_mode = #tpu.pipeline_mode<synchronous>, transform_indices = @transform_1, window_bounds = array<i64: 128, 128>}, {pipeline_mode = #tpu.pipeline_mode<synchronous>, transform_indices = @transform_2, window_bounds = array<i64: 1, 128>}, {pipeline_mode = #tpu.pipeline_mode<synchronous>, transform_indices = @transform_3, window_bounds = array<i64: 2, 128, 128>}, {pipeline_mode = #tpu.pipeline_mode<synchronous>, transform_indices = @transform_4, window_bounds = array<i64: 2, 128>}, {pipeline_mode = #tpu.pipeline_mode<synchronous>, transform_indices = @transform_5, window_bounds = array<i64: 128, 128>}, {pipeline_mode = #tpu.pipeline_mode<synchronous>, transform_indices = @transform_6, window_bounds = array<i64: 1, 128>}, {pipeline_mode = #tpu.pipeline_mode<synchronous>, transform_indices = @transform_7, window_bounds = array<i64: 128, 128>}, {pipeline_mode = #tpu.pipeline_mode<synchronous>, transform_indices = @transform_8, window_bounds = array<i64: 1, 128>}, {transform_indices = @transform_9, window_bounds = array<i64: 8, 128>}]} {
    %c0 = arith.constant 0 : index
    %c0_0 = arith.constant 0 : index
    %0 = vector.load %arg1[%c0, %c0_0] : memref<8x128xf32, #tpu.memory_space<vmem>>, vector<8x128xf32>
    %c0_1 = arith.constant 0 : index
    %c0_2 = arith.constant 0 : index
    %1 = vector.load %arg2[%c0_1, %c0_2] : memref<128x128xf32, #tpu.memory_space<vmem>>, vector<128x128xf32>
    %cst = arith.constant dense<0.000000e+00> : vector<8x128xf32>
    %2 = tpu.matmul %0, %1, %cst {dimension_numbers = #tpu.dot_dimension_numbers<[1], [0], [0], [1], [0, 0, 1, 1], [], []>} : vector<8x128xf32>, vector<128x128xf32>, vector<8x128xf32> -> vector<8x128xf32>
    %c0_3 = arith.constant 0 : index
    %c0_4 = arith.constant 0 : index
    %3 = vector.load %arg3[%c0_3, %c0_4] : memref<1x128xf32, #tpu.memory_space<vmem>>, vector<1x128xf32>
    %4 = vector.broadcast %3 : vector<1x128xf32> to vector<8x128xf32>
    %5 = arith.addf %2, %4 : vector<8x128xf32>
    %cst_5 = arith.constant 0.000000e+00 : f32
    %6 = vector.broadcast %cst_5 : f32 to vector<8x128xf32>
    %7 = arith.maximumf %5, %6 : vector<8x128xf32>
    %c0_6 = arith.constant 0 : index
    %c0_7 = arith.constant 0 : index
    %c0_8 = arith.constant 0 : index
    %8 = vector.load %arg4[%c0_6, %c0_7, %c0_8] : memref<2x128x128xf32, #tpu.memory_space<vmem>>, vector<1x128x128xf32>
    %9 = vector.shape_cast %8 : vector<1x128x128xf32> to vector<128x128xf32>
    %cst_9 = arith.constant dense<0.000000e+00> : vector<8x128xf32>
    %10 = tpu.matmul %7, %9, %cst_9 {dimension_numbers = #tpu.dot_dimension_numbers<[1], [0], [0], [1], [0, 0, 1, 1], [], []>} : vector<8x128xf32>, vector<128x128xf32>, vector<8x128xf32> -> vector<8x128xf32>
    %c0_10 = arith.constant 0 : index
    %c0_11 = arith.constant 0 : index
    %11 = vector.load %arg5[%c0_10, %c0_11] : memref<2x128xf32, #tpu.memory_space<vmem>>, vector<1x128xf32>
    %12 = vector.broadcast %11 : vector<1x128xf32> to vector<8x128xf32>
    %13 = arith.addf %10, %12 : vector<8x128xf32>
    %cst_12 = arith.constant 0.000000e+00 : f32
    %14 = vector.broadcast %cst_12 : f32 to vector<8x128xf32>
    %15 = arith.maximumf %13, %14 : vector<8x128xf32>
    %c1 = arith.constant 1 : index
    %c0_13 = arith.constant 0 : index
    %c0_14 = arith.constant 0 : index
    %16 = vector.load %arg4[%c1, %c0_13, %c0_14] : memref<2x128x128xf32, #tpu.memory_space<vmem>>, vector<1x128x128xf32>
    %17 = vector.shape_cast %16 : vector<1x128x128xf32> to vector<128x128xf32>
    %cst_15 = arith.constant dense<0.000000e+00> : vector<8x128xf32>
    %18 = tpu.matmul %15, %17, %cst_15 {dimension_numbers = #tpu.dot_dimension_numbers<[1], [0], [0], [1], [0, 0, 1, 1], [], []>} : vector<8x128xf32>, vector<128x128xf32>, vector<8x128xf32> -> vector<8x128xf32>
    %c1_16 = arith.constant 1 : index
    %c0_17 = arith.constant 0 : index
    %19 = vector.load %arg5[%c1_16, %c0_17] : memref<2x128xf32, #tpu.memory_space<vmem>>, vector<1x128xf32>
    %20 = vector.broadcast %19 : vector<1x128xf32> to vector<8x128xf32>
    %21 = arith.addf %18, %20 : vector<8x128xf32>
    %cst_18 = arith.constant 0.000000e+00 : f32
    %22 = vector.broadcast %cst_18 : f32 to vector<8x128xf32>
    %23 = arith.maximumf %21, %22 : vector<8x128xf32>
    %c0_19 = arith.constant 0 : index
    %c0_20 = arith.constant 0 : index
    %24 = vector.load %arg6[%c0_19, %c0_20] : memref<128x128xf32, #tpu.memory_space<vmem>>, vector<128x128xf32>
    %cst_21 = arith.constant dense<0.000000e+00> : vector<8x128xf32>
    %25 = tpu.matmul %23, %24, %cst_21 {dimension_numbers = #tpu.dot_dimension_numbers<[1], [0], [0], [1], [0, 0, 1, 1], [], []>} : vector<8x128xf32>, vector<128x128xf32>, vector<8x128xf32> -> vector<8x128xf32>
    %c0_22 = arith.constant 0 : index
    %c0_23 = arith.constant 0 : index
    %26 = vector.load %arg7[%c0_22, %c0_23] : memref<1x128xf32, #tpu.memory_space<vmem>>, vector<1x128xf32>
    %27 = vector.broadcast %26 : vector<1x128xf32> to vector<8x128xf32>
    %28 = arith.addf %25, %27 : vector<8x128xf32>
    %cst_24 = arith.constant 0.000000e+00 : f32
    %29 = vector.broadcast %cst_24 : f32 to vector<8x128xf32>
    %30 = arith.maximumf %28, %29 : vector<8x128xf32>
    %c0_25 = arith.constant 0 : index
    %c0_26 = arith.constant 0 : index
    %31 = vector.load %arg8[%c0_25, %c0_26] : memref<128x128xf32, #tpu.memory_space<vmem>>, vector<128x128xf32>
    %cst_27 = arith.constant dense<0.000000e+00> : vector<8x128xf32>
    %32 = tpu.matmul %30, %31, %cst_27 {dimension_numbers = #tpu.dot_dimension_numbers<[1], [0], [0], [1], [0, 0, 1, 1], [], []>} : vector<8x128xf32>, vector<128x128xf32>, vector<8x128xf32> -> vector<8x128xf32>
    %c0_28 = arith.constant 0 : index
    %c0_29 = arith.constant 0 : index
    %33 = vector.load %arg9[%c0_28, %c0_29] : memref<1x128xf32, #tpu.memory_space<vmem>>, vector<1x128xf32>
    %34 = vector.broadcast %33 : vector<1x128xf32> to vector<8x128xf32>
    %35 = arith.addf %32, %34 : vector<8x128xf32>
    %36 = tpu.iota {dimensions = array<i32: 1>} : vector<8x128xi32>
    %c8_i32 = arith.constant 8 : i32
    %37 = vector.broadcast %c8_i32 : i32 to vector<8x128xi32>
    %38 = arith.cmpi slt, %36, %37 : vector<8x128xi32>
    %cst_30 = arith.constant -1.000000e+30 : f32
    %39 = vector.broadcast %cst_30 : f32 to vector<8x128xf32>
    %40 = arith.select %38, %35, %39 : vector<8x128xi1>, vector<8x128xf32>
    %cst_31 = arith.constant dense<0xFF800000> : vector<8xf32>
    %41 = vector.multi_reduction <maximumf>, %40, %cst_31 [1] : vector<8x128xf32> to vector<8xf32>
    %42 = vector.shape_cast %41 : vector<8xf32> to vector<8x1xf32>
    %43 = vector.broadcast %42 : vector<8x1xf32> to vector<8x128xf32>
    %44 = arith.subf %40, %43 : vector<8x128xf32>
    %45 = math.exp %44 : vector<8x128xf32>
    %cst_32 = arith.constant dense<0.000000e+00> : vector<8xf32>
    %46 = vector.multi_reduction <add>, %45, %cst_32 [1] : vector<8x128xf32> to vector<8xf32>
    %47 = vector.shape_cast %46 : vector<8xf32> to vector<8x1xf32>
    %48 = tpu.reciprocal %47 {approx = true} : vector<8x1xf32> -> vector<8x1xf32>
    %49 = vector.broadcast %48 : vector<8x1xf32> to vector<8x128xf32>
    %50 = arith.mulf %45, %49 : vector<8x128xf32>
    %51 = vector.extract_strided_slice %35 {offsets = [0, 8], sizes = [8, 1], strides = [1, 1]} : vector<8x128xf32> to vector<8x1xf32>
    %52 = math.tanh %51 : vector<8x1xf32>
    %c8_i32_33 = arith.constant 8 : i32
    %53 = vector.broadcast %c8_i32_33 : i32 to vector<8x128xi32>
    %54 = arith.cmpi eq, %36, %53 : vector<8x128xi32>
    %55 = vector.shape_cast %52 : vector<8x1xf32> to vector<8x1xf32>
    %56 = vector.broadcast %55 : vector<8x1xf32> to vector<8x128xf32>
    %57 = arith.select %54, %56, %50 : vector<8x128xi1>, vector<8x128xf32>
    %c0_34 = arith.constant 0 : index
    %c0_35 = arith.constant 0 : index
    %58 = vector.load %arg10[%c0_34, %c0_35] : memref<8x128xf32, #tpu.memory_space<vmem>>, vector<8x128xf32>
    tpu.vector_store %arg10[%c0_34, %c0_35], %57 {strides = array<i32>} : memref<8x128xf32, #tpu.memory_space<vmem>>, vector<8x128xf32>,
    return
  }
  func.func @transform_0(%arg0: i32) -> (i32, i32) {
    %c0_i32 = arith.constant 0 : i32
    %c0_i32_0 = arith.constant 0 : i32
    return %arg0, %c0_i32 : i32, i32
  }
  func.func @transform_1(%arg0: i32) -> (i32, i32) {
    %c0_i32 = arith.constant 0 : i32
    %c0_i32_0 = arith.constant 0 : i32
    %c0_i32_1 = arith.constant 0 : i32
    return %c0_i32, %c0_i32_0 : i32, i32
  }
  func.func @transform_2(%arg0: i32) -> (i32, i32) {
    %c0_i32 = arith.constant 0 : i32
    %c0_i32_0 = arith.constant 0 : i32
    %c0_i32_1 = arith.constant 0 : i32
    return %c0_i32, %c0_i32_0 : i32, i32
  }
  func.func @transform_3(%arg0: i32) -> (i32, i32, i32) {
    %c0_i32 = arith.constant 0 : i32
    %c0_i32_0 = arith.constant 0 : i32
    %c0_i32_1 = arith.constant 0 : i32
    %c0_i32_2 = arith.constant 0 : i32
    return %c0_i32, %c0_i32_0, %c0_i32_1 : i32, i32, i32
  }
  func.func @transform_4(%arg0: i32) -> (i32, i32) {
    %c0_i32 = arith.constant 0 : i32
    %c0_i32_0 = arith.constant 0 : i32
    %c0_i32_1 = arith.constant 0 : i32
    return %c0_i32, %c0_i32_0 : i32, i32
  }
  func.func @transform_5(%arg0: i32) -> (i32, i32) {
    %c0_i32 = arith.constant 0 : i32
    %c0_i32_0 = arith.constant 0 : i32
    %c0_i32_1 = arith.constant 0 : i32
    return %c0_i32, %c0_i32_0 : i32, i32
  }
  func.func @transform_6(%arg0: i32) -> (i32, i32) {
    %c0_i32 = arith.constant 0 : i32
    %c0_i32_0 = arith.constant 0 : i32
    %c0_i32_1 = arith.constant 0 : i32
    return %c0_i32, %c0_i32_0 : i32, i32
  }
  func.func @transform_7(%arg0: i32) -> (i32, i32) {
    %c0_i32 = arith.constant 0 : i32
    %c0_i32_0 = arith.constant 0 : i32
    %c0_i32_1 = arith.constant 0 : i32
    return %c0_i32, %c0_i32_0 : i32, i32
  }
  func.func @transform_8(%arg0: i32) -> (i32, i32) {
    %c0_i32 = arith.constant 0 : i32
    %c0_i32_0 = arith.constant 0 : i32
    %c0_i32_1 = arith.constant 0 : i32
    return %c0_i32, %c0_i32_0 : i32, i32
  }
  func.func @transform_9(%arg0: i32) -> (i32, i32) {
    %c0_i32 = arith.constant 0 : i32
    %c0_i32_0 = arith.constant 0 : i32
    return %arg0, %c0_i32 : i32, i32
  }
}

</mosaic_0001>

<bundles_post_ra>
// kernel: _alphaghost_forward_impl.1
= control target key start
LH: loop header
LB: loop body
LE: loop exit
PB: predicated region body
PF: predicated region fallthrough
CT: control target
= control target key end

     0   :  { %14 = vsyncpa [#allocation3], 0  ;;  %s538_s0 = inlined_call_operand.vmem [shape: f32[8,128], index: 0, kind: input, shape index: {}]   ;;  %s539_s1 = inlined_call_operand.hbm [shape: f32[128,128], index: 1, kind: input, shape index: {}]   ;;  %s540_s2 = inlined_call_operand.vmem [shape: f32[1,128], index: 2, kind: input, shape index: {}]   ;;  %s541_s3 = inlined_call_operand.hbm [shape: f32[2,128,128], index: 3, kind: input, shape index: {}]   ;;  %s542_s4 = inlined_call_operand.vmem [shape: f32[2,128], index: 4, kind: input, shape index: {}]   ;;  %s543_s5 = inlined_call_operand.hbm [shape: f32[128,128], index: 5, kind: input, shape index: {}]   ;;  %s544_s6 = inlined_call_operand.vmem [shape: f32[1,128], index: 6, kind: input, shape index: {}]   ;;  %s545_s7 = inlined_call_operand.hbm [shape: f32[128,128], index: 7, kind: input, shape index: {}]   ;;  %s546_s8 = inlined_call_operand.vmem [shape: f32[1,128], index: 8, kind: input, shape index: {}]   ;;  %s547_s9 = inlined_call_operand.vmem [shape: f32[8,128], index: 9, kind: output, shape index: {}]  }
   0x1   :  { %15 = vsyncpa [#allocation5], 0 }
   0x2   :  { %16 = vsyncpa [#allocation8], 0  ;;  %s38_s11 = sshll.u32 %s541_s3, 4  ;;  %s448_s12 = smov [#allocation4]   ;;  %s39_s11 = int_to_ptr.hbm [resolvable:$true] %s38_s11 }
   0x3   :  { %s40_s13 = sshll.u32 %s448_s12, 4  ;;  %s23_s16 = sshll.u32 %s539_s1, 4  ;;  %s41_s13 = int_to_ptr.vmem [resolvable:$true] %s40_s13  ;;  %s24_s16 = int_to_ptr.hbm [resolvable:$true] %s23_s16 }
   0x4   :  { %s449_s17 = smov 128   ;;  %s450_s18 = smov 8  }
   0x5   :  { %46 = dma.hbm_to_vmem [thread:$0]  %s39_s11, 4096, %s41_s13, [#allocation5], %s449_s17, %s449_s17, %s450_s18  }
   0x6   :  { %s451_s19 = smov [#allocation2]   ;;  %s53_s23 = sshll.u32 %s543_s5, 4  ;;  %s54_s23 = int_to_ptr.hbm [resolvable:$true] %s53_s23 }
   0x7   :  { %s25_s20 = sshll.u32 %s451_s19, 4  ;;  %s68_s25 = sshll.u32 %s545_s7, 4  ;;  %s26_s20 = int_to_ptr.vmem [resolvable:$true] %s25_s20  ;;  %s69_s25 = int_to_ptr.hbm [resolvable:$true] %s68_s25 }
   0x8   :  { %31 = dma.hbm_to_vmem [thread:$0]  %s24_s16, 2048, %s26_s20, [#allocation3], %s449_s17, %s449_s17, %s450_s18  }
   0x9   :  { %s452_s26 = smov [#allocation6]   ;;  %s453_s1 = smov [#allocation7]  }
   0xa   :  { %s55_s27 = sshll.u32 %s452_s26, 4  ;;  %s70_s28 = sshll.u32 %s453_s1, 4  ;;  %s56_s27 = int_to_ptr.vmem [resolvable:$true] %s55_s27  ;;  %s71_s28 = int_to_ptr.vmem [resolvable:$true] %s70_s28 }
   0xb   :  { %61 = dma.hbm_to_vmem [thread:$0]  %s54_s23, 2048, %s56_s27, [#allocation5], %s449_s17, %s449_s17, %s450_s18  }
   0xc   :  { %76 = dma.hbm_to_vmem [thread:$0]  %s69_s25, 2048, %s71_s28, [#allocation8], %s449_s17, %s449_s17, %s450_s18  }
   0xd   :  { %442 = dma.done.wait [#allocation3], 2048  }
   0xe   :  { %443 = vsyncadd [#allocation3], 4294965248 }
   0xf   :  { %444 = dma.done.wait [#allocation5], 6144  }
  0x10   :  { %445 = vsyncadd [#allocation5], 4294961152 }
  0x11   :  { %446 = dma.done.wait [#allocation8], 2048  }
  0x12   :  { %447 = vsyncadd [#allocation8], 4294965248  ;;  %v111_v0 = vld [vmem:[#allocation2 + $0x78] sm:$0xff]  ;;  %v110_v1 = vld [vmem:[#allocation2 + $0x70] sm:$0xff] }
  0x13   :  { %116 = vmatpush.msra.mxu0 %v111_v0  ;;  %v109_v2 = vld [vmem:[#allocation2 + $0x68] sm:$0xff]  ;;  %v108_v3 = vld [vmem:[#allocation2 + $0x60] sm:$0xff]  ;;  %v152_v4 = vld [vmem:[#allocation4 + $0x78] sm:$0xff] }
  0x14   :  { %v107_v5 = vld [vmem:[#allocation2 + $0x58] sm:$0xff]  ;;  %155 = vmatpush.msra.mxu1 %v152_v4  ;;  %v151_v6 = vld [vmem:[#allocation4 + $0x70] sm:$0xff]  ;;  %v150_v7 = vld [vmem:[#allocation4 + $0x68] sm:$0xff] }
  0x15   :  { %117 = vmatpush.msra.mxu0 %v110_v1  ;;  %v106_v8 = vld [vmem:[#allocation2 + $0x50] sm:$0xff]  ;;  %v105_v9 = vld [vmem:[#allocation2 + $0x48] sm:$0xff]  ;;  %v149_v10 = vld [vmem:[#allocation4 + $0x60] sm:$0xff] }
  0x16   :  { %156 = vmatpush.msra.mxu1 %v151_v6  ;;  %v148_v11 = vld [vmem:[#allocation4 + $0x58] sm:$0xff]  ;;  %v104_v12 = vld [vmem:[#allocation2 + $0x40] sm:$0xff]  ;;  %v147_v13 = vld [vmem:[#allocation4 + $0x50] sm:$0xff] }
  0x17   :  { %118 = vmatpush.msra.mxu0 %v109_v2  ;;  %v103_v14 = vld [vmem:[#allocation2 + $0x38] sm:$0xff]  ;;  %v146_v15 = vld [vmem:[#allocation4 + $0x48] sm:$0xff]  ;;  %v102_v16 = vld [vmem:[#allocation2 + $0x30] sm:$0xff] }
  0x18   :  { %157 = vmatpush.msra.mxu1 %v150_v7  ;;  %v145_v17 = vld [vmem:[#allocation4 + $0x40] sm:$0xff]  ;;  %v101_v18 = vld [vmem:[#allocation2 + $0x28] sm:$0xff]  ;;  %v144_v19 = vld [vmem:[#allocation4 + $0x38] sm:$0xff] }
  0x19   :  { %119 = vmatpush.msra.mxu0 %v108_v3  ;;  %v100_v20 = vld [vmem:[#allocation2 + $0x20] sm:$0xff]  ;;  %v143_v21 = vld [vmem:[#allocation4 + $0x30] sm:$0xff]  ;;  %v99_v22 = vld [vmem:[#allocation2 + $0x18] sm:$0xff] }
  0x1a   :  { %158 = vmatpush.msra.mxu1 %v149_v10  ;;  %v142_v23 = vld [vmem:[#allocation4 + $0x28] sm:$0xff]  ;;  %v98_v24 = vld [vmem:[#allocation2 + $0x10] sm:$0xff]  ;;  %v141_v25 = vld [vmem:[#allocation4 + $0x20] sm:$0xff] }
  0x1b   :  { %120 = vmatpush.msra.mxu0 %v107_v5  ;;  %v97_v26 = vld [vmem:[#allocation2 + $0x8] sm:$0xff]  ;;  %v140_v27 = vld [vmem:[#allocation4 + $0x18] sm:$0xff]  ;;  %v96_v28 = vld [vmem:[#allocation2] sm:$0xff] }
  0x1c   :  { %159 = vmatpush.msra.mxu1 %v148_v11  ;;  %v95_v29 = vld [vmem:[%s538_s0] sm:$0xff]  ;;  %v139_v30 = vld [vmem:[#allocation4 + $0x10] sm:$0xff]  ;;  %v138_v31 = vld [vmem:[#allocation4 + $0x8] sm:$0xff] }
  0x1d   :  { %121 = vmatpush.msra.mxu0 %v106_v8  ;;  %v137_v32 = vld [vmem:[#allocation4] sm:$0xff]  ;;  %v192_v33 = vld [vmem:[#allocation4 + $0xf8] sm:$0xff]  ;;  %v191_v34 = vld [vmem:[#allocation4 + $0xf0] sm:$0xff] }
  0x1e   :  { %160 = vmatpush.msra.mxu1 %v147_v13  ;;  %195 = vmatpush.msra.mxu2 %v192_v33  ;;  %v190_v35 = vld [vmem:[#allocation4 + $0xe8] sm:$0xff]  ;;  %v189_v36 = vld [vmem:[#allocation4 + $0xe0] sm:$0xff]  ;;  %v188_v37 = vld [vmem:[#allocation4 + $0xd8] sm:$0xff]  ;;  %v454_v33 = vmov 8  }
  0x1f   :  { %122 = vmatpush.msra.mxu0 %v105_v9  ;;  %v187_v38 = vld [vmem:[#allocation4 + $0xd0] sm:$0xff]  ;;  %v186_v39 = vld [vmem:[#allocation4 + $0xc8] sm:$0xff]  ;;  %v185_v40 = vld [vmem:[#allocation4 + $0xc0] sm:$0xff]  ;;  %333 = vset.pattern.permute.xlu1 %v454_v33 }
  0x20   :  { %161 = vmatpush.msra.mxu1 %v146_v15  ;;  %196 = vmatpush.msra.mxu2 %v191_v34  ;;  %v184_v41 = vld [vmem:[#allocation4 + $0xb8] sm:$0xff]  ;;  %v183_v42 = vld [vmem:[#allocation4 + $0xb0] sm:$0xff]  ;;  %v182_v43 = vld [vmem:[#allocation4 + $0xa8] sm:$0xff]  ;;  %v297_v34 = vlaneseq }
  0x21   :  { %123 = vmatpush.msra.mxu0 %v104_v12  ;;  %v181_v44 = vld [vmem:[#allocation4 + $0xa0] sm:$0xff]  ;;  %v180_v45 = vld [vmem:[#allocation4 + $0x98] sm:$0xff]  ;;  %v179_v50 = vld [vmem:[#allocation4 + $0x90] sm:$0xff]  ;;  %334 = vset.pattern.permute.xlu0 %v454_v33 }
  0x22   :  { %162 = vmatpush.msra.mxu1 %v145_v17  ;;  %197 = vmatpush.msra.mxu2 %v190_v35  ;;  %v335_v46 = vld [vmem:[%s540_s2] ss:$0 sm:$0xff]  ;;  %v178_v51 = vld [vmem:[#allocation4 + $0x88] sm:$0xff]  ;;  %v231_v53 = vld [vmem:[#allocation6 + $0x78] sm:$0xff]  ;;  %v298_v35 = vand.u32 127, %v297_v34 }
  0x23   :  { %124 = vmatpush.msra.mxu0 %v103_v14  ;;  %v177_v52 = vld [vmem:[#allocation4 + $0x80] sm:$0xff]  ;;  %v230_v54 = vld [vmem:[#allocation6 + $0x70] sm:$0xff]  ;;  %236 = vmatpush.msra.mxu3 %v231_v53  ;;  %v229_v55 = vld [vmem:[#allocation6 + $0x68] sm:$0xff] }
  0x24   :  { %163 = vmatpush.msra.mxu1 %v144_v19  ;;  %198 = vmatpush.msra.mxu2 %v189_v36  ;;  %v228_v56 = vld [vmem:[#allocation6 + $0x60] sm:$0xff]  ;;  %v227_v57 = vld [vmem:[#allocation6 + $0x58] sm:$0xff]  ;;  %v226_v58 = vld [vmem:[#allocation6 + $0x50] sm:$0xff]  ;;  %vm299_vm0 = vcmp.lt.s32.totalorder %v298_v35, 8  ;;  %vm311_vm1 = vcmp.eq.s32.totalorder %v298_v35, 8 }
  0x25   :  { %125 = vmatpush.msra.mxu0 %v102_v16  ;;  %237 = vmatpush.msra.mxu3 %v230_v54  ;;  %v225_v59 = vld [vmem:[#allocation6 + $0x48] sm:$0xff]  ;;  %v224_v60 = vld [vmem:[#allocation6 + $0x40] sm:$0xff]  ;;  %v223_v61 = vld [vmem:[#allocation6 + $0x38] sm:$0xff] }
  0x26   :  { %164 = vmatpush.msra.mxu1 %v143_v21  ;;  %199 = vmatpush.msra.mxu2 %v188_v37  ;;  %v222_v62 = vld [vmem:[#allocation6 + $0x30] sm:$0xff]  ;;  %v221_v63 = vld [vmem:[#allocation6 + $0x28] sm:$0xff]  ;;  %v220_v0 = vld [vmem:[#allocation6 + $0x20] sm:$0xff] }
  0x27   :  { %126 = vmatpush.msra.mxu0 %v101_v18  ;;  %238 = vmatpush.msra.mxu3 %v229_v55  ;;  %v219_v1 = vld [vmem:[#allocation6 + $0x18] sm:$0xff]  ;;  %v336_v2 = vld [vmem:[%s542_s4] ss:$0 sm:$0xff]  ;;  %v218_v6 = vld [vmem:[#allocation6 + $0x10] sm:$0xff] }
  0x28   :  { %165 = vmatpush.msra.mxu1 %v142_v23  ;;  %200 = vmatpush.msra.mxu2 %v187_v38  ;;  %v217_v7 = vld [vmem:[#allocation6 + $0x8] sm:$0xff]  ;;  %v216_v8 = vld [vmem:[#allocation6] sm:$0xff]  ;;  %v272_v9 = vld [vmem:[#allocation7 + $0x78] sm:$0xff] }
  0x29   :  { %127 = vmatpush.msra.mxu0 %v100_v20  ;;  %239 = vmatpush.msra.mxu3 %v228_v56  ;;  %v271_v10 = vld [vmem:[#allocation7 + $0x70] sm:$0xff]  ;;  %v270_v11 = vld [vmem:[#allocation7 + $0x68] sm:$0xff]  ;;  %v269_v12 = vld [vmem:[#allocation7 + $0x60] sm:$0xff] }
  0x2a   :  { %166 = vmatpush.msra.mxu1 %v141_v25  ;;  %201 = vmatpush.msra.mxu2 %v186_v39  ;;  %v268_v13 = vld [vmem:[#allocation7 + $0x58] sm:$0xff]  ;;  %v267_v14 = vld [vmem:[#allocation7 + $0x50] sm:$0xff]  ;;  %v266_v15 = vld [vmem:[#allocation7 + $0x48] sm:$0xff] }
  0x2b   :  { %128 = vmatpush.msra.mxu0 %v99_v22  ;;  %240 = vmatpush.msra.mxu3 %v227_v57  ;;  %v265_v16 = vld [vmem:[#allocation7 + $0x40] sm:$0xff]  ;;  %v264_v17 = vld [vmem:[#allocation7 + $0x38] sm:$0xff]  ;;  %v263_v18 = vld [vmem:[#allocation7 + $0x30] sm:$0xff] }
  0x2c   :  { %167 = vmatpush.msra.mxu1 %v140_v27  ;;  %202 = vmatpush.msra.mxu2 %v185_v40  ;;  %v262_v19 = vld [vmem:[#allocation7 + $0x28] sm:$0xff]  ;;  %v261_v20 = vld [vmem:[#allocation7 + $0x20] sm:$0xff]  ;;  %v260_v21 = vld [vmem:[#allocation7 + $0x18] sm:$0xff] }
  0x2d   :  { %129 = vmatpush.msra.mxu0 %v98_v24  ;;  %241 = vmatpush.msra.mxu3 %v226_v58  ;;  %v337_v22 = vld [vmem:[%s542_s4 + $0x1] ss:$0 sm:$0xff]  ;;  %v258_v27 = vld [vmem:[#allocation7 + $0x8] sm:$0xff]  ;;  %v339_v36 = vld [vmem:[%s546_s8] ss:$0 sm:$0xff] }
  0x2e   :  { %168 = vmatpush.msra.mxu1 %v139_v30  ;;  %203 = vmatpush.msra.mxu2 %v184_v41 }
  0x2f   :  { %130 = vmatpush.msra.mxu0 %v97_v26  ;;  %242 = vmatpush.msra.mxu3 %v225_v59  ;;  %v259_v26 = vld [vmem:[#allocation7 + $0x10] sm:$0xff] }
  0x30   :  { %169 = vmatpush.msra.mxu1 %v138_v31  ;;  %204 = vmatpush.msra.mxu2 %v183_v42 }
  0x31   :  { %131 = vmatpush.msra.mxu0 %v96_v28  ;;  %243 = vmatpush.msra.mxu3 %v224_v60  ;;  %v257_v28 = vld [vmem:[#allocation7] sm:$0xff] }
  0x32   :  { %132 = vmatmul.f32.vlgmr.msra.gmra.mxu0 %v95_v29  ;;  %170 = vmatpush.msra.mxu1 %v137_v32  ;;  %v338_v29 = vld [vmem:[%s544_s6] ss:$0 sm:$0xff] }
  0x33   :  { %205 = vmatpush.msra.mxu2 %v182_v43  ;;  %244 = vmatpush.msra.mxu3 %v223_v61 }
  0x34   :  { %277 = vmatpush.msrb.mxu0 %v272_v9 }
  0x35   :  { %206 = vmatpush.msra.mxu2 %v181_v44  ;;  %245 = vmatpush.msra.mxu3 %v222_v62 }
  0x36   :  { %278 = vmatpush.msrb.mxu0 %v271_v10 }
  0x37   :  { %207 = vmatpush.msra.mxu2 %v180_v45  ;;  %246 = vmatpush.msra.mxu3 %v221_v63 }
  0x38   :  { %279 = vmatpush.msrb.mxu0 %v270_v11 }
  0x39   :  { %208 = vmatpush.msra.mxu2 %v179_v50  ;;  %247 = vmatpush.msra.mxu3 %v220_v0 }
  0x3a   :  { %280 = vmatpush.msrb.mxu0 %v269_v12 }
  0x3b   :  { %209 = vmatpush.msra.mxu2 %v178_v51  ;;  %248 = vmatpush.msra.mxu3 %v219_v1 }
  0x3c   :  { %281 = vmatpush.msrb.mxu0 %v268_v13 }
  0x3d   :  { %210 = vmatpush.msra.mxu2 %v177_v52  ;;  %249 = vmatpush.msra.mxu3 %v218_v6 }
  0x3e   :  { %282 = vmatpush.msrb.mxu0 %v267_v14 }
  0x3f   :  { %250 = vmatpush.msra.mxu3 %v217_v7 }
  0x40   :  { %283 = vmatpush.msrb.mxu0 %v266_v15 }
  0x41   :  { %251 = vmatpush.msra.mxu3 %v216_v8 }
  0x42   :  { %284 = vmatpush.msrb.mxu0 %v265_v16 }
  0x44   :  { %285 = vmatpush.msrb.mxu0 %v264_v17 }
  0x46   :  { %286 = vmatpush.msrb.mxu0 %v263_v18 }
  0x48   :  { %287 = vmatpush.msrb.mxu0 %v262_v19 }
  0x4a   :  { %288 = vmatpush.msrb.mxu0 %v261_v20 }
  0x4c   :  { %289 = vmatpush.msrb.mxu0 %v260_v21 }
  0x4e   :  { %290 = vmatpush.msrb.mxu0 %v259_v26 }
  0x50   :  { %291 = vmatpush.msrb.mxu0 %v258_v27 }
  0x52   :  { %292 = vmatpush.msrb.mxu0 %v257_v28 }
  0xaf   :  { %v133_v47 = vpop.f32.mrf.mxu0 }
  0xb0   :  { %v134_v48 = vadd.f32 %v335_v46, %v133_v47 }
  0xb2   :  { %v136_v49 = vmax.f32 %v134_v48, 0.0 }
  0xb4   :  { %171 = vmatmul.f32.vlgmr.msra.gmra.mxu1 %v136_v49 }
 0x131   :  { %v172_v3 = vpop.f32.mrf.mxu1 }
 0x132   :  { %v173_v4 = vadd.f32 %v336_v2, %v172_v3 }
 0x134   :  { %v175_v5 = vmax.f32 %v173_v4, 0.0 }
 0x136   :  { %211 = vmatmul.f32.vlgmr.msra.gmra.mxu2 %v175_v5 }
 0x1b9   :  { %v212_v23 = vpop.f32.mrf.mxu2 }
 0x1ba   :  { %v213_v24 = vadd.f32 %v337_v22, %v212_v23 }
 0x1bc   :  { %v215_v25 = vmax.f32 %v213_v24, 0.0 }
 0x1be   :  { %252 = vmatmul.f32.vlgmr.msra.gmra.mxu3 %v215_v25 }
 0x241   :  { %v253_v30 = vpop.f32.mrf.mxu3 }
 0x242   :  { %v254_v31 = vadd.f32 %v338_v29, %v253_v30 }
 0x244   :  { %v256_v32 = vmax.f32 %v254_v31, 0.0 }
 0x246   :  { %293 = vmatmul.f32.vlgmr.msrb.gmra.mxu0 %v256_v32 }
 0x2c3   :  { %v294_v37 = vpop.f32.mrf.mxu0 }
 0x2c4   :  { %v295_v38 = vadd.f32 %v339_v36, %v294_v37 }
 0x2c6   :  { %340 = vtanh.f32 %v295_v38  ;;  %v300_v39 = vsel %vm299_vm0, %v295_v38, -1e+30 }
 0x2c7   :  { %301 = vmax.xlane.f32.xlu0 %v300_v39 }
 0x2cc   :  { %v341_v40 = vpop.eup %340 }
 0x2cd   :  { %314 = vperm.xlu1 %333, %v341_v40  }
 0x33a   :  { %v302_v41 = vpop.xlane.xlu0 %301 }
 0x33b   :  { %v303_v42 = vsub.f32 %v300_v39, %v302_v41 }
 0x33d   :  { %v304_v43 = vmul.f32 1.442695, %v303_v42 }
 0x33f   :  { %342 = vpow2.f32 %v304_v43  ;;  %v315_v48 = vpop.permute.xlu1 %314 }
 0x345   :  { %v343_v44 = vpop.eup %342 }
 0x346   :  { %306 = vadd.xlane.f32.xlu0 %v343_v44 }
 0x3b9   :  { %v307_v45 = vpop.xlane.xlu0 %306 }
 0x3ba   :  { %344 = vrcp.f32 %v307_v45 }
 0x3c0   :  { %v345_v46 = vpop.eup %344 }
 0x3c1   :  { %v309_v47 = vmul.f32 %v345_v46, %v343_v44 }
 0x3c3   :  { %v317_v49 = vsel %vm311_vm1, %v315_v48, %v309_v47 }
 0x3c4   :  { %318 = vst [vmem:[%s547_s9] sm:$0xff] %v317_v49 }
 0x3c5   :  { %323 = vsyncpa [#allocation3], 1 }
 0x3c6   :  { %324 = vsyncpa [#allocation5], 1 }
 0x3c7   :  { %325 = vsyncpa [#allocation8], 1 }

</bundles_post_ra>
